<compile_context>
chip_gen: v7x
topology: tpu7x:2x2x1
jax: 0.10.0
libtpu: 0.0.40
codegen_flags: <defaults>
</compile_context>

<pallas_src>
import jax
import jax.numpy as jnp
from jax.experimental import pallas as pl
from jax.experimental.pallas import tpu as pltpu

EEG_DIM = 100
AUDIO_DIM = 80
TEXT_DIM = 20                                   # forward slices 0:100, 100:180, 180:
IN_DIM = EEG_DIM + AUDIO_DIM + TEXT_DIM         # 200 (native K, no padding)
EEG_OUT = 64
AUDIO_OUT = 32
TEXT_OUT = 32
FUSION_DIM = EEG_OUT + AUDIO_OUT + TEXT_OUT     # 128
HIDDEN_DIM = 128
OUT_DIM = 1

SUBLANE = 16                                    # bf16 sublane granularity


def fusion_kernel(x_ref, w_in_ref, b_in_ref, w_f1_ref, b_f1_ref,
                  w_out_ref, b_out_ref, out_ref):
    x = x_ref[...]                                                   # [Bt, 200] bf16

    # Stage 1: fused block-diagonal projection (bf16 MXU, f32 accumulate)
    # + fused modality biases + ReLU.
    h1 = jnp.dot(x, w_in_ref[...], preferred_element_type=jnp.float32)
    h1 = jnp.maximum(h1 + b_in_ref[...], 0.0)                        # [Bt, 128] f32

    # Stage 2: fusion hidden layer (bf16 MXU, f32 accumulate).
    h2 = jnp.dot(h1.astype(jnp.bfloat16), w_f1_ref[...],
                 preferred_element_type=jnp.float32)
    h2 = jnp.maximum(h2 + b_f1_ref[...], 0.0)                        # [Bt, 128] f32

    # Stage 3: N=1 projection on VPU + XLU (multiply + lane reduce),
    # keeping the MXU dependency chain short.
    out = jnp.sum(h2 * w_out_ref[...], axis=-1, keepdims=True) + b_out_ref[...]

    out_ref[...] = out.astype(out_ref.dtype)                         # [Bt, 1]


def fuse_params(params):
    """Host-side: build the block-diagonal stage-1 weight (bf16), the fused
    stage-1 bias vector (f32), and the reshaped tail params."""
    (w_eeg, b_eeg, w_aud, b_aud, w_txt, b_txt, w_f1, b_f1, w_f2, b_f2) = params

    w_in = jnp.zeros((IN_DIM, FUSION_DIM), jnp.float32)
    w_in = w_in.at[0:EEG_DIM, 0:EEG_OUT].set(w_eeg)
    w_in = w_in.at[EEG_DIM:EEG_DIM + AUDIO_DIM,
                   EEG_OUT:EEG_OUT + AUDIO_OUT].set(w_aud)
    w_in = w_in.at[EEG_DIM + AUDIO_DIM:IN_DIM,
                   EEG_OUT + AUDIO_OUT:FUSION_DIM].set(w_txt)

    b_in = jnp.concatenate([b_eeg, b_aud, b_txt], axis=1)            # [1, 128] f32
    w_out_row = w_f2.T.reshape(1, HIDDEN_DIM)                        # [1, 128] f32
    b_out = b_f2.reshape(1, 1)                                       # [1, 1]  f32

    return (w_in.astype(jnp.bfloat16),                               # [200,128] bf16
            b_in.astype(jnp.float32),                                # [1,128]   f32
            w_f1.astype(jnp.bfloat16),                               # [128,128] bf16
            b_f1.astype(jnp.float32),                                # [1,128]   f32
            w_out_row.astype(jnp.float32),                           # [1,128]   f32
            b_out.astype(jnp.float32))                               # [1,1]     f32


def _round_up(v, m):
    return ((v + m - 1) // m) * m


def fusion_forward(x, fused_params, *, b_tile=4096):
    """Fused forward pass. Batch is tiled on a 1-D 'parallel' grid; all weights
    stay VMEM-resident across grid steps (constant index_maps)."""
    w_in, b_in, w_f1, b_f1, w_out, b_out = fused_params
    B = x.shape[0]

    # Batch tile: multiples of 16 sublanes (bf16). For B >= 256 force at least
    # two grid blocks so v7x can shard the parallel axis across both TCs.
    if B >= 256:
        tile = min(b_tile, _round_up(pl.cdiv(B, 2), SUBLANE))
    else:
        tile = _round_up(max(B, SUBLANE), SUBLANE)
    tile = min(tile, b_tile)

    grid_len = pl.cdiv(B, tile)
    B_pad = grid_len * tile

    # Row-only padding (<= tile-1 rows), folded into the one-time bf16 cast.
    x_bf = x.astype(jnp.bfloat16)
    if B_pad != B:
        x_bf = jnp.pad(x_bf, ((0, B_pad - B), (0, 0)))

    out_padded = pl.pallas_call(
        fusion_kernel,
        out_shape=jax.ShapeDtypeStruct((B_pad, OUT_DIM), jnp.float32),
        grid_spec=pltpu.PrefetchScalarGridSpec(
            num_scalar_prefetch=0,
            grid=(grid_len,),
            in_specs=[
                pl.BlockSpec((tile, IN_DIM), lambda i: (i, 0)),            # x tile (K native)
                pl.BlockSpec((IN_DIM, FUSION_DIM), lambda i: (0, 0)),      # W_in (resident)
                pl.BlockSpec((1, FUSION_DIM), lambda i: (0, 0)),           # fused stage-1 bias
                pl.BlockSpec((FUSION_DIM, HIDDEN_DIM), lambda i: (0, 0)),  # W_f1 (resident)
                pl.BlockSpec((1, HIDDEN_DIM), lambda i: (0, 0)),           # b_f1
                pl.BlockSpec((1, HIDDEN_DIM), lambda i: (0, 0)),           # w_out row
                pl.BlockSpec((1, 1), lambda i: (0, 0)),                    # b_out
            ],
            out_specs=pl.BlockSpec((tile, OUT_DIM), lambda i: (i, 0)),
        ),
        compiler_params=pltpu.CompilerParams(
            dimension_semantics=("parallel",)),
    )(x_bf, w_in, b_in, w_f1, b_f1, w_out, b_out)

    return out_padded[:B]


def init_params(key):
    """Deterministic parameter init matching the PyTorch module's shapes."""
    def linear(key, fan_in, fan_out):
        kw, kb = jax.random.split(key)
        bound = 1.0 / jnp.sqrt(fan_in)
        w = jax.random.uniform(kw, (fan_in, fan_out), jnp.float32, -bound, bound)
        b = jax.random.uniform(kb, (1, fan_out), jnp.float32, -bound, bound)
        return w, b

    keys = jax.random.split(key, 5)
    w_eeg, b_eeg = linear(keys[0], EEG_DIM, EEG_OUT)
    w_aud, b_aud = linear(keys[1], AUDIO_DIM, AUDIO_OUT)
    w_txt, b_txt = linear(keys[2], TEXT_DIM, TEXT_OUT)
    w_f1, b_f1 = linear(keys[3], FUSION_DIM, HIDDEN_DIM)
    w_f2, b_f2 = linear(keys[4], HIDDEN_DIM, OUT_DIM)
    return (w_eeg, b_eeg, w_aud, b_aud, w_txt, b_txt, w_f1, b_f1, w_f2, b_f2)


def reference_forward(x, params):
    """Pure-JAX f32 reference (mirrors the PyTorch forward, eval-mode dropout)."""
    (w_eeg, b_eeg, w_aud, b_aud, w_txt, b_txt, w_f1, b_f1, w_f2, b_f2) = params
    eeg = x[:, :EEG_DIM]
    aud = x[:, EEG_DIM:EEG_DIM + AUDIO_DIM]
    txt = x[:, EEG_DIM + AUDIO_DIM:]
    h_eeg = jnp.maximum(eeg @ w_eeg + b_eeg, 0.0)
    h_aud = jnp.maximum(aud @ w_aud + b_aud, 0.0)
    h_txt = jnp.maximum(txt @ w_txt + b_txt, 0.0)
    combined = jnp.concatenate([h_eeg, h_aud, h_txt], axis=1)
    h = jnp.maximum(combined @ w_f1 + b_f1, 0.0)
    return h @ w_f2 + b_f2


if __name__ == "__main__":
    key = jax.random.PRNGKey(0)
    k_x, k_p = jax.random.split(key)

    params = init_params(k_p)
    fused = fuse_params(params)

    # TODO(synk): dropout layers are eval-mode identity here (no RNG masking).

    # Small batch (single grid block).
    B = 8
    x = jax.random.normal(k_x, (B, IN_DIM), dtype=jnp.float32)
    out = jax.block_until_ready(fusion_forward(x, fused))
    ref = reference_forward(x, params)
    assert out.shape == (B, OUT_DIM), out.shape
    assert jnp.allclose(out, ref, atol=2e-2, rtol=2e-2), \
        f"max abs err {jnp.max(jnp.abs(out - ref))}"

    # Mid-size batch (exercises >= 2 parallel grid blocks + row padding).
    B2 = 300
    x2 = jax.random.normal(jax.random.PRNGKey(1), (B2, IN_DIM), dtype=jnp.float32)
    out2 = jax.block_until_ready(fusion_forward(x2, fused))
    ref2 = reference_forward(x2, params)
    assert out2.shape == (B2, OUT_DIM), out2.shape
    assert jnp.allclose(out2, ref2, atol=2e-2, rtol=2e-2), \
        f"max abs err {jnp.max(jnp.abs(out2 - ref2))}"

    print("KERNEL_OK")
</pallas_src>

<mosaic_0001>
module attributes {stable_mosaic.version = 11 : i64} {
  func.func @fusion_kernel(%arg0: i32, %arg1: memref<16x200xbf16, #tpu.memory_space<vmem>>, %arg2: memref<200x128xbf16, #tpu.memory_space<vmem>>, %arg3: memref<1x128xf32, #tpu.memory_space<vmem>>, %arg4: memref<128x128xbf16, #tpu.memory_space<vmem>>, %arg5: memref<1x128xf32, #tpu.memory_space<vmem>>, %arg6: memref<1x128xf32, #tpu.memory_space<vmem>>, %arg7: memref<1x1xf32, #tpu.memory_space<vmem>>, %arg8: memref<16x1xf32, #tpu.memory_space<vmem>>) attributes {dimension_semantics = [#tpu.dimension_semantics<parallel>], iteration_bounds = array<i64: 1>, scalar_prefetch = 0 : i64, scratch_operands = 0 : i64, tpu.core_type = #tpu.core_type<tc>, window_params = [{transform_indices = @transform_0, window_bounds = array<i64: 16, 200>}, {pipeline_mode = #tpu.pipeline_mode<synchronous>, transform_indices = @transform_1, window_bounds = array<i64: 200, 128>}, {pipeline_mode = #tpu.pipeline_mode<synchronous>, transform_indices = @transform_2, window_bounds = array<i64: 1, 128>}, {pipeline_mode = #tpu.pipeline_mode<synchronous>, transform_indices = @transform_3, window_bounds = array<i64: 128, 128>}, {pipeline_mode = #tpu.pipeline_mode<synchronous>, transform_indices = @transform_4, window_bounds = array<i64: 1, 128>}, {pipeline_mode = #tpu.pipeline_mode<synchronous>, transform_indices = @transform_5, window_bounds = array<i64: 1, 128>}, {pipeline_mode = #tpu.pipeline_mode<synchronous>, transform_indices = @transform_6, window_bounds = array<i64: 1, 1>}, {transform_indices = @transform_7, window_bounds = array<i64: 16, 1>}]} {
    %c0 = arith.constant 0 : index
    %c0_0 = arith.constant 0 : index
    %0 = vector.load %arg1[%c0, %c0_0] : memref<16x200xbf16, #tpu.memory_space<vmem>>, vector<16x200xbf16>
    %c0_1 = arith.constant 0 : index
    %c0_2 = arith.constant 0 : index
    %1 = vector.load %arg2[%c0_1, %c0_2] : memref<200x128xbf16, #tpu.memory_space<vmem>>, vector<200x128xbf16>
    %cst = arith.constant dense<0.000000e+00> : vector<16x128xf32>
    %2 = tpu.matmul %0, %1, %cst {dimension_numbers = #tpu.dot_dimension_numbers<[1], [0], [0], [1], [0, 0, 1, 1], [], []>} : vector<16x200xbf16>, vector<200x128xbf16>, vector<16x128xf32> -> vector<16x128xf32>
    %c0_3 = arith.constant 0 : index
    %c0_4 = arith.constant 0 : index
    %3 = vector.load %arg3[%c0_3, %c0_4] : memref<1x128xf32, #tpu.memory_space<vmem>>, vector<1x128xf32>
    %4 = vector.broadcast %3 : vector<1x128xf32> to vector<16x128xf32>
    %5 = arith.addf %2, %4 : vector<16x128xf32>
    %cst_5 = arith.constant 0.000000e+00 : f32
    %6 = vector.broadcast %cst_5 : f32 to vector<16x128xf32>
    %7 = arith.maximumf %5, %6 : vector<16x128xf32>
    %8 = arith.truncf %7 : vector<16x128xf32> to vector<16x128xbf16>
    %c0_6 = arith.constant 0 : index
    %c0_7 = arith.constant 0 : index
    %9 = vector.load %arg4[%c0_6, %c0_7] : memref<128x128xbf16, #tpu.memory_space<vmem>>, vector<128x128xbf16>
    %cst_8 = arith.constant dense<0.000000e+00> : vector<16x128xf32>
    %10 = tpu.matmul %8, %9, %cst_8 {dimension_numbers = #tpu.dot_dimension_numbers<[1], [0], [0], [1], [0, 0, 1, 1], [], []>} : vector<16x128xbf16>, vector<128x128xbf16>, vector<16x128xf32> -> vector<16x128xf32>
    %c0_9 = arith.constant 0 : index
    %c0_10 = arith.constant 0 : index
    %11 = vector.load %arg5[%c0_9, %c0_10] : memref<1x128xf32, #tpu.memory_space<vmem>>, vector<1x128xf32>
    %12 = vector.broadcast %11 : vector<1x128xf32> to vector<16x128xf32>
    %13 = arith.addf %10, %12 : vector<16x128xf32>
    %cst_11 = arith.constant 0.000000e+00 : f32
    %14 = vector.broadcast %cst_11 : f32 to vector<16x128xf32>
    %15 = arith.maximumf %13, %14 : vector<16x128xf32>
    %c0_12 = arith.constant 0 : index
    %c0_13 = arith.constant 0 : index
    %16 = vector.load %arg6[%c0_12, %c0_13] : memref<1x128xf32, #tpu.memory_space<vmem>>, vector<1x128xf32>
    %17 = vector.broadcast %16 : vector<1x128xf32> to vector<16x128xf32>
    %18 = arith.mulf %15, %17 : vector<16x128xf32>
    %cst_14 = arith.constant dense<0.000000e+00> : vector<16xf32>
    %19 = vector.multi_reduction <add>, %18, %cst_14 [1] : vector<16x128xf32> to vector<16xf32>
    %20 = vector.shape_cast %19 : vector<16xf32> to vector<16x1xf32>
    %c0_15 = arith.constant 0 : index
    %c0_16 = arith.constant 0 : index
    %21 = vector.load %arg7[%c0_15, %c0_16] : memref<1x1xf32, #tpu.memory_space<vmem>>, vector<1x1xf32>
    %22 = vector.broadcast %21 : vector<1x1xf32> to vector<16x1xf32>
    %23 = arith.addf %20, %22 : vector<16x1xf32>
    %c0_17 = arith.constant 0 : index
    %c0_18 = arith.constant 0 : index
    %24 = vector.load %arg8[%c0_17, %c0_18] : memref<16x1xf32, #tpu.memory_space<vmem>>, vector<16x1xf32>
    tpu.vector_store %arg8[%c0_17, %c0_18], %23 {strides = array<i32>} : memref<16x1xf32, #tpu.memory_space<vmem>>, vector<16x1xf32>,
    return
  }
  func.func @transform_0(%arg0: i32) -> (i32, i32) {
    %c0_i32 = arith.constant 0 : i32
    %c0_i32_0 = arith.constant 0 : i32
    return %arg0, %c0_i32 : i32, i32
  }
  func.func @transform_1(%arg0: i32) -> (i32, i32) {
    %c0_i32 = arith.constant 0 : i32
    %c0_i32_0 = arith.constant 0 : i32
    %c0_i32_1 = arith.constant 0 : i32
    return %c0_i32, %c0_i32_0 : i32, i32
  }
  func.func @transform_2(%arg0: i32) -> (i32, i32) {
    %c0_i32 = arith.constant 0 : i32
    %c0_i32_0 = arith.constant 0 : i32
    %c0_i32_1 = arith.constant 0 : i32
    return %c0_i32, %c0_i32_0 : i32, i32
  }
  func.func @transform_3(%arg0: i32) -> (i32, i32) {
    %c0_i32 = arith.constant 0 : i32
    %c0_i32_0 = arith.constant 0 : i32
    %c0_i32_1 = arith.constant 0 : i32
    return %c0_i32, %c0_i32_0 : i32, i32
  }
  func.func @transform_4(%arg0: i32) -> (i32, i32) {
    %c0_i32 = arith.constant 0 : i32
    %c0_i32_0 = arith.constant 0 : i32
    %c0_i32_1 = arith.constant 0 : i32
    return %c0_i32, %c0_i32_0 : i32, i32
  }
  func.func @transform_5(%arg0: i32) -> (i32, i32) {
    %c0_i32 = arith.constant 0 : i32
    %c0_i32_0 = arith.constant 0 : i32
    %c0_i32_1 = arith.constant 0 : i32
    return %c0_i32, %c0_i32_0 : i32, i32
  }
  func.func @transform_6(%arg0: i32) -> (i32, i32) {
    %c0_i32 = arith.constant 0 : i32
    %c0_i32_0 = arith.constant 0 : i32
    %c0_i32_1 = arith.constant 0 : i32
    return %c0_i32, %c0_i32_0 : i32, i32
  }
  func.func @transform_7(%arg0: i32) -> (i32, i32) {
    %c0_i32 = arith.constant 0 : i32
    %c0_i32_0 = arith.constant 0 : i32
    return %arg0, %c0_i32 : i32, i32
  }
}

</mosaic_0001>

<bundles_post_ra>
// kernel: tpu_custom_call.1
= control target key start
LH: loop header
LB: loop body
LE: loop exit
PB: predicated region body
PF: predicated region fallthrough
CT: control target
= control target key end

     0   :  { %s665_s0 = inlined_call_operand.hbm [shape: bf16[16,200], index: 0, kind: input, shape index: {}]   ;;  %s666_s1 = inlined_call_operand.hbm [shape: bf16[200,128], index: 1, kind: input, shape index: {}]   ;;  %s667_s2 = inlined_call_operand.vmem [shape: f32[1,128], index: 2, kind: input, shape index: {}]   ;;  %s668_s3 = inlined_call_operand.hbm [shape: bf16[128,128], index: 3, kind: input, shape index: {}]   ;;  %s669_s4 = inlined_call_operand.vmem [shape: f32[1,128], index: 4, kind: input, shape index: {}]   ;;  %s670_s5 = inlined_call_operand.vmem [shape: f32[1,128], index: 5, kind: input, shape index: {}]   ;;  %s671_s6 = inlined_call_operand.<no memory space> [shape: f32[1,1], index: 6, kind: input, shape index: {}]   ;;  %s672_s7 = inlined_call_operand.vmem [shape: f32[16,1], index: 7, kind: output, shape index: {}]  }
   0x1   :  { %v12_v0 = vstv %s671_s6 }
   0x2   :  { %13 = vst [vmem:[#allocation2] sm:$0x1] %v12_v0 }
   0x3   :  { %14 = vsyncpa [#allocation4], 0 }
   0x4   :  { %15 = vsyncpa [#allocation6], 0  ;;  %s546_s26 = smov [#allocation5]   ;;  %s476_s30 = scalar_lea.hbm %s666_s1, 1600 }
   0x5   :  { %s33_s27 = sshll.u32 %s546_s26, 4  ;;  %p477_p0 = scmp.ne.s32.totalorder %s666_s1, %s476_s30  ;;  %s34_s27 = int_to_ptr.vmem [resolvable:$true] %s33_s27 }
   0x6   :  { %p480_p1 = scmp.lt.u32.totalorder %s476_s30, %s666_s1 }
   0x8   :  { %p482_p2 = pnand %p480_p1, %p477_p0 }
   0xa   :  { %485 = shalt.err (!%p482_p2)
}
   0xb   :  { %s486_s6 = scalar_lea.vmem %s34_s27, 1600  ;;  %p491_p4 = scmp.lt.s32.totalorder %s34_s27, %s34_s27 }
   0xc   :  { %p487_p3 = scmp.ne.s32.totalorder %s34_s27, %s486_s6  ;;  %p492_p5 = scmp.lt.s32.totalorder %s486_s6, %s486_s6 }
   0xe   :  { %p493_p6 = por %p492_p5, %p491_p4 }
  0x10   :  { %p494_p7 = pnand %p493_p6, %p487_p3 }
  0x12   :  { %497 = shalt.err (!%p494_p7)
}
  0x13   :  { %s547_s12 = smov 64   ;;  %s548_s13 = smov 4  }
  0x14   :  { %39 = dma.hbm_to_vmem [thread:$0]  %s666_s1, 1600, %s34_s27, [#allocation6], %s547_s12, %s547_s12, %s548_s13  }
  0x15   :  { %s549_s16 = smov [#allocation3]   ;;  %s498_s20 = scalar_lea.hbm %s665_s0, 256 }
  0x16   :  { %s21_s17 = sshll.u32 %s549_s16, 4  ;;  %p499_p8 = scmp.ne.s32.totalorder %s665_s0, %s498_s20  ;;  %s22_s17 = int_to_ptr.vmem [resolvable:$true] %s21_s17 }
  0x17   :  { %p502_p9 = scmp.lt.u32.totalorder %s498_s20, %s665_s0 }
  0x19   :  { %p504_p10 = pnand %p502_p9, %p499_p8 }
  0x1b   :  { %507 = shalt.err (!%p504_p10)
}
  0x1c   :  { %s508_s25 = scalar_lea.vmem %s22_s17, 256  ;;  %p513_p12 = scmp.lt.s32.totalorder %s22_s17, %s22_s17 }
  0x1d   :  { %p509_p11 = scmp.ne.s32.totalorder %s22_s17, %s508_s25  ;;  %p514_p13 = scmp.lt.s32.totalorder %s508_s25, %s508_s25 }
  0x1f   :  { %p515_p0 = por %p514_p13, %p513_p12 }
  0x21   :  { %p516_p1 = pnand %p515_p0, %p509_p11 }
  0x23   :  { %519 = shalt.err (!%p516_p1)
}
  0x24   :  { %s550_s1 = smov 128   ;;  %s551_s26 = smov 8  }
  0x25   :  { %27 = dma.hbm_to_vmem [thread:$0]  %s665_s0, 256, %s22_s17, [#allocation4], %s550_s1, %s550_s1, %s551_s26  }
  0x26   :  { %s552_s29 = smov [#allocation7]   ;;  %s520_s10 = scalar_lea.hbm %s668_s3, 1024 }
  0x27   :  { %s47_s30 = sshll.u32 %s552_s29, 4  ;;  %p521_p2 = scmp.ne.s32.totalorder %s668_s3, %s520_s10  ;;  %s48_s30 = int_to_ptr.vmem [resolvable:$true] %s47_s30 }
  0x28   :  { %p524_p3 = scmp.lt.u32.totalorder %s520_s10, %s668_s3 }
  0x2a   :  { %p526_p4 = pnand %p524_p3, %p521_p2 }
  0x2c   :  { %529 = shalt.err (!%p526_p4)
}
  0x2d   :  { %s530_s16 = scalar_lea.vmem %s48_s30, 1024  ;;  %p535_p6 = scmp.lt.s32.totalorder %s48_s30, %s48_s30 }
  0x2e   :  { %p531_p5 = scmp.ne.s32.totalorder %s48_s30, %s530_s16  ;;  %p536_p7 = scmp.lt.s32.totalorder %s530_s16, %s530_s16 }
  0x30   :  { %p537_p8 = por %p536_p7, %p535_p6 }
  0x32   :  { %p538_p9 = pnand %p537_p8, %p531_p5 }
  0x34   :  { %541 = shalt.err (!%p538_p9)
}
  0x35   :  { %53 = dma.hbm_to_vmem [thread:$0]  %s668_s3, 1024, %s48_s30, [#allocation6], %s547_s12, %s547_s12, %s548_s13  }
  0x36   :  { %542 = dma.done.wait [#allocation4], 256  }
  0x37   :  { %543 = vsyncadd [#allocation4], 4294967040 }
  0x38   :  { %544 = dma.done.wait [#allocation6], 2624  }
  0x39   :  { %545 = vsyncadd [#allocation6], 4294964672  ;;  %v553_v1 = vmov 0   ;;  %v554_v2 = vmov 0.0   ;;  %v452_v3 = vld [vmem:[#allocation5] sm:$0xff]   ;;  %v453_v4 = vld [vmem:[#allocation5 + $0x8] sm:$0xff]  }
  0x3a   :  { %196 = vmatprep.subr.bf16.mxu0 %v553_v1  ;;  %422 = vmatprep.subr.bf16.mxu1 %v554_v2  ;;  %v454_v5 = vld [vmem:[#allocation5 + $0x10] sm:$0xff]   ;;  %v455_v6 = vld [vmem:[#allocation5 + $0x18] sm:$0xff]   ;;  %vm188_vm0 = vcmask 588800   ;;  %v456_v7 = vld [vmem:[#allocation5 + $0x20] sm:$0xff]   ;;  %vm192_vm1 = vcmask 1043456   ;;  %vm555_vm2 = vmmov 0  }
  0x3b   :  { %197 = vmatpush1.bf16.msra.mxu0 %v452_v3  ;;  %v467_v8 = vld [vmem:[#allocation3 + $0x4] ss:$8 sps:$4 sm:$0xff]   ;;  %v468_v9 = vld [vmem:[#allocation7] sm:$0xff]   ;;  %v469_v10 = vld [vmem:[#allocation7 + $0x8] sm:$0xff]   ;;  %438 = vmatprep.mubr.msk.bf16.mxu1 %vm555_vm2, %v554_v2  ;;  %vm376_vm3 = vcmask 7168  }
  0x3c   :  { %198 = vmatprep.subr.bf16.mxu0 %v553_v1  ;;  %401 = vmatprep.mubr.msk.bf16.mxu0 %vm188_vm0, %v467_v8  ;;  %v457_v11 = vld [vmem:[#allocation5 + $0x28] sm:$0xff]   ;;  %v470_v12 = vld [vmem:[#allocation7 + $0x10] sm:$0xff]   ;;  %v471_v14 = vld [vmem:[#allocation7 + $0x18] sm:$0xff]  }
  0x3d   :  { %423 = vmatpush3.bf16.msra.mxu1 %v468_v9  ;;  %v458_v13 = vld [vmem:[#allocation5 + $0x30] sm:$0xff]   ;;  %v459_v15 = vld [vmem:[#allocation5 + $0x38] sm:$0xff]   ;;  %v472_v16 = vld [vmem:[#allocation7 + $0x20] sm:$0xff]  }
  0x3e   :  { %424 = vmatprep.subr.bf16.mxu1 %v554_v2  ;;  %v460_v17 = vld [vmem:[#allocation5 + $0x40] sm:$0xff]   ;;  %v473_v18 = vld [vmem:[#allocation7 + $0x28] sm:$0xff]   ;;  %v463_v21 = vld [vmem:[#allocation5 + $0x58] sm:$0xff]  }
  0x3f   :  { %199 = vmatpush1.bf16.msra.mxu0 %v453_v4  ;;  %v461_v19 = vld [vmem:[#allocation5 + $0x48] sm:$0xff]   ;;  %v462_v20 = vld [vmem:[#allocation5 + $0x50] sm:$0xff]   ;;  %v464_v22 = vld [vmem:[#allocation5 + $0x60] ss:$0 sps:$4 sm:$0xff]  }
  0x40   :  { %200 = vmatprep.subr.bf16.mxu0 %v553_v1  ;;  %v194_v23 = vsel %vm192_vm1, %v464_v22, 0  ;;  %v465_v24 = vld [vmem:[#allocation3] ss:$8 sps:$4 sm:$0xff]   ;;  %v475_v26 = vld [vmem:[#allocation7 + $0x38] sm:$0xff]   ;;  %v385_v27 = vld [vmem:[%s667_s2] ss:$0 sm:$0xff] }
  0x41   :  { %425 = vmatpush3.bf16.msra.mxu1 %v469_v10  ;;  %v474_v25 = vld [vmem:[#allocation7 + $0x30] sm:$0xff]   ;;  %v402_v37 = vld [vmem:[%s669_s4] ss:$0 sm:$0xff] }
  0x42   :  { %426 = vmatprep.subr.bf16.mxu1 %v554_v2  ;;  %v411_v42 = vld [vmem:[%s670_s5] ss:$0 sm:$0xff] }
  0x43   :  { %201 = vmatpush1.bf16.msra.mxu0 %v454_v5  ;;  %v412_v49 = vld [vmem:[#allocation2] ss:$0 sm:$0xff] }
  0x44   :  { %202 = vmatprep.subr.bf16.mxu0 %v553_v1 }
  0x45   :  { %427 = vmatpush3.bf16.msra.mxu1 %v470_v12 }
  0x46   :  { %428 = vmatprep.subr.bf16.mxu1 %v554_v2 }
  0x47   :  { %203 = vmatpush1.bf16.msra.mxu0 %v455_v6 }
  0x48   :  { %204 = vmatprep.subr.bf16.mxu0 %v553_v1 }
  0x49   :  { %429 = vmatpush3.bf16.msra.mxu1 %v471_v14 }
  0x4a   :  { %430 = vmatprep.subr.bf16.mxu1 %v554_v2 }
  0x4b   :  { %205 = vmatpush1.bf16.msra.mxu0 %v456_v7 }
  0x4c   :  { %206 = vmatprep.subr.bf16.mxu0 %v553_v1 }
  0x4d   :  { %431 = vmatpush3.bf16.msra.mxu1 %v472_v16 }
  0x4e   :  { %432 = vmatprep.subr.bf16.mxu1 %v554_v2 }
  0x4f   :  { %207 = vmatpush1.bf16.msra.mxu0 %v457_v11 }
  0x50   :  { %208 = vmatprep.subr.bf16.mxu0 %v553_v1 }
  0x51   :  { %433 = vmatpush3.bf16.msra.mxu1 %v473_v18 }
  0x52   :  { %434 = vmatprep.subr.bf16.mxu1 %v554_v2 }
  0x53   :  { %209 = vmatpush1.bf16.msra.mxu0 %v458_v13 }
  0x54   :  { %210 = vmatprep.subr.bf16.mxu0 %v553_v1 }
  0x55   :  { %435 = vmatpush3.bf16.msra.mxu1 %v474_v25 }
  0x56   :  { %436 = vmatprep.subr.bf16.mxu1 %v554_v2 }
  0x57   :  { %211 = vmatpush1.bf16.msra.mxu0 %v459_v15 }
  0x58   :  { %212 = vmatprep.subr.bf16.mxu0 %v553_v1 }
  0x59   :  { %437 = vmatpush3.bf16.msra.mxu1 %v475_v26 }
  0x5b   :  { %213 = vmatpush1.bf16.msra.mxu0 %v460_v17 }
  0x5c   :  { %214 = vmatprep.subr.bf16.mxu0 %v553_v1 }
  0x5f   :  { %215 = vmatpush1.bf16.msra.mxu0 %v461_v19 }
  0x60   :  { %216 = vmatprep.subr.bf16.mxu0 %v553_v1 }
  0x63   :  { %217 = vmatpush1.bf16.msra.mxu0 %v462_v20 }
  0x64   :  { %218 = vmatprep.subr.bf16.mxu0 %v553_v1 }
  0x67   :  { %219 = vmatpush1.bf16.msra.mxu0 %v463_v21 }
  0x68   :  { %220 = vmatprep.subr.bf16.mxu0 %v553_v1 }
  0x6b   :  { %221 = vmatpush1.bf16.msra.mxu0 %v194_v23 }
  0x6e   :  { %229 = vmatmul.mubr.bf16.vlgmr.msra.gmra.mrb[0].mxu0 %v465_v24 }
 0x141   :  { %v230_v28 = vpop.f32.mrb[0].mxu0 }
 0x142   :  { %v231_v29 = vadd.f32 %v385_v27, %v230_v28  ;;  %v232_v30 = vpop.f32.mrb[1].mxu0 }
 0x143   :  { %v233_v31 = vpop.f32.mrb[2].mxu0 }
 0x144   :  { %v234_v32 = vadd.f32 %v385_v27, %v233_v31  ;;  %v235_v33 = vpop.f32.mrb[3].mxu0  ;;  %v237_v34 = vmax.f32 %v231_v29, 0.0 }
 0x146   :  { %v238_v35 = vmax.f32 %v234_v32, 0.0 }
 0x148   :  { %v239_v36 = vpack.c.bf16 %v238_v35, %v237_v34 }
 0x14a   :  { %439 = vmatmul.mubr.bf16.vlgmr.msra.gmra.mrb[0].mxu1 %v239_v36 }
 0x21d   :  { %v345_v38 = vpop.f32.mrb[0].mxu1 }
 0x21e   :  { %v346_v39 = vadd.f32 %v402_v37, %v345_v38  ;;  %v440_v40 = vpop.f32.mrb[1].mxu1 }
 0x21f   :  { %v348_v41 = vpop.f32.mrb[2].mxu1 }
 0x220   :  { %v352_v43 = vmax.f32 %v346_v39, 0.0  ;;  %v349_v44 = vadd.f32 %v402_v37, %v348_v41  ;;  %v441_v45 = vpop.f32.mrb[3].mxu1 }
 0x222   :  { %v353_v46 = vmax.f32 %v349_v44, 0.0  ;;  %v361_v47 = vmul.f32 %v411_v42, %v352_v43 }
 0x224   :  { %363 = vadd.xlane.f32.xlu0 %v361_v47  ;;  %v362_v48 = vmul.f32 %v411_v42, %v353_v46 }
 0x228   :  { %365 = vadd.xlane.f32.xlu0 %v362_v48 }
 0x2b1   :  { %v364_v50 = vpop.xlane.xlu0 %363 }
 0x2b2   :  { %v374_v51 = vadd.f32 %v412_v49, %v364_v50 }
 0x2b4   :  { %377 = vst.msk [vmem:[%s672_s7] sm:$0xff] %vm376_vm3, %v374_v51 }
 0x2b5   :  { %v366_v52 = vpop.xlane.xlu0 %365 }
 0x2b6   :  { %v375_v53 = vadd.f32 %v412_v49, %v366_v52 }
 0x2b8   :  { %378 = vst.msk [vmem:[%s672_s7 + $0x8] sm:$0xff] %vm376_vm3, %v375_v53 }
 0x2b9   :  { %383 = vsyncpa [#allocation4], 1 }
 0x2ba   :  { %384 = vsyncpa [#allocation6], 1 }

</bundles_post_ra>
